<compile_context>
chip_gen: v5e
topology: v5e:2x2
jax: 0.10.0
libtpu: 0.0.40
codegen_flags: <defaults>
</compile_context>

<pallas_src>
import math

import jax
import jax.numpy as jnp
from jax.experimental import pallas as pl
from jax.experimental.pallas import tpu as pltpu


def _round_up(x, m):
    return ((x + m - 1) // m) * m


def _pad_2d(a, rows, cols, dtype):
    """Zero-pad a 2-D array to (rows, cols); no copy if already that shape/dtype."""
    a = a.astype(dtype)
    r, c = a.shape
    if r == rows and c == cols:
        return a
    return jnp.pad(a, ((0, rows - r), (0, cols - c)))


# -----------------------------------------------------------------------------
# Kernel 1: support = X @ W   (computed once, not per adjacency k-step)
# -----------------------------------------------------------------------------
def _support_kernel(x_ref, w_ref, sup_ref):
    sup_ref[...] = jnp.dot(
        x_ref[...], w_ref[...], preferred_element_type=jnp.float32
    ).astype(sup_ref.dtype)


# -----------------------------------------------------------------------------
# Kernel 2: out = inv_rowsum * (adj @ support + support) + bias
# grid = (N/tm, N/tk); k (reduction over adjacency columns) is the last axis.
# -----------------------------------------------------------------------------
def _gcn_agg_kernel(adj_ref, sup_k_ref, sup_i_ref, b_ref, out_ref,
                    acc_ref, row_ref):
    k = pl.program_id(1)

    @pl.when(k == 0)
    def _():
        acc_ref[...] = jnp.zeros_like(acc_ref)
        row_ref[...] = jnp.ones_like(row_ref)   # the "+1" from adj + I

    adj = adj_ref[...]
    # Row-sum of this adjacency tile (XLU); accumulate in f32 even if adj is bf16.
    row_ref[...] += jnp.sum(adj.astype(jnp.float32), axis=1, keepdims=True)
    # MXU matmul with f32 accumulation.
    acc_ref[...] += jnp.dot(adj, sup_k_ref[...],
                            preferred_element_type=jnp.float32)

    @pl.when(k == pl.num_programs(1) - 1)
    def _():
        inv = 1.0 / row_ref[...]
        inv = jnp.where(jnp.isnan(inv), 0.0, inv)  # mirrors temp[temp != temp] = 0
        out = inv * (acc_ref[...] + sup_i_ref[...].astype(jnp.float32))
        out_ref[...] = (out + b_ref[...]).astype(out_ref.dtype)


def graph_convolution(x, adj, weight, bias, *, use_bf16=False):
    """GCN forward. x:(N,Fin) adj:(N,N) weight:(Fin,Fout) bias:(Fout,).

    use_bf16: cast the adjacency and support matmul operands to bf16
    (f32 accumulation).  Exact for 0/1 adjacency; support loses mantissa
    (precision-accepted fast path).
    """
    n, f_in = x.shape
    f_out = weight.shape[1]
    f32 = jnp.float32
    compute_dtype = jnp.bfloat16 if use_bf16 else f32

    # --- tile selection ------------------------------------------------------
    # Single tile up to N=512 (no grid overhead); otherwise 512x512 tiles
    # (512-wide blocks measured ~85% of HBM roofline; footprint per step
    # ~2-4 MiB double-buffered, comfortably under default scoped VMEM).
    if n <= 512:
        tm = tk = _round_up(max(n, 8), 128)
        n_pad = tm
    else:
        tm = tk = 512
        n_pad = _round_up(n, 512)

    f_pad = _round_up(f_out, 128)             # lane-dense support/output slab

    # --- pad to tile multiples (zero padding is exact: padded rows/cols are
    #     zero, padded outputs are sliced off) ------------------------------
    x_p = _pad_2d(x, n_pad, f_in, f32)
    adj_p = _pad_2d(adj, n_pad, n_pad, compute_dtype)
    w_p = _pad_2d(weight, f_in, f_pad, f32)
    b_p = _pad_2d(bias.reshape(1, -1), 1, f_pad, f32)

    # ---- support = X @ W ---------------------------------------------------
    support = pl.pallas_call(
        _support_kernel,
        out_shape=jax.ShapeDtypeStruct((n_pad, f_pad), compute_dtype),
        grid=(n_pad // tm,),
        in_specs=[
            pl.BlockSpec((tm, f_in), lambda i: (i, 0)),
            pl.BlockSpec((f_in, f_pad), lambda i: (0, 0)),
        ],
        out_specs=pl.BlockSpec((tm, f_pad), lambda i: (i, 0)),
        compiler_params=pltpu.CompilerParams(
            dimension_semantics=("parallel",)),
        cost_estimate=pl.CostEstimate(
            flops=2 * n_pad * f_in * f_pad,
            transcendentals=0,
            bytes_accessed=(x_p.size + w_p.size) * 4
            + n_pad * f_pad * jnp.dtype(compute_dtype).itemsize),
    )(x_p, w_p)

    # ---- aggregation: inv * (adj @ support + support) + bias ---------------
    itemsize = jnp.dtype(compute_dtype).itemsize
    bytes_accessed = (n_pad * n_pad * itemsize            # adj streamed once
                      + 2 * n_pad * f_pad * itemsize      # support (k and i views)
                      + n_pad * f_pad * 4)                # f32 output

    out_p = pl.pallas_call(
        _gcn_agg_kernel,
        out_shape=jax.ShapeDtypeStruct((n_pad, f_pad), jnp.float32),
        grid=(n_pad // tm, n_pad // tk),
        in_specs=[
            pl.BlockSpec((tm, tk), lambda i, k: (i, k)),      # adjacency tile
            pl.BlockSpec((tk, f_pad), lambda i, k: (k, 0)),   # support rows [k]
            pl.BlockSpec((tm, f_pad), lambda i, k: (i, 0)),   # support rows [i] (self-loop)
            pl.BlockSpec((1, f_pad), lambda i, k: (0, 0)),    # bias
        ],
        out_specs=pl.BlockSpec((tm, f_pad), lambda i, k: (i, 0)),
        scratch_shapes=[
            pltpu.VMEM((tm, f_pad), jnp.float32),             # matmul accumulator
            pltpu.VMEM((tm, 1), jnp.float32),                 # row-sum accumulator
        ],
        compiler_params=pltpu.CompilerParams(
            dimension_semantics=("parallel", "arbitrary")),
        cost_estimate=pl.CostEstimate(
            flops=2 * n_pad * n_pad * f_pad,
            transcendentals=0,
            bytes_accessed=bytes_accessed),
    )(adj_p, support, support, b_p)

    return out_p[:n, :f_out]


def reference_gcn(x, adj, weight, bias):
    """Pure-JAX reference mirroring the PyTorch forward exactly."""
    n = adj.shape[0]
    adj_hat = adj + jnp.eye(n, dtype=adj.dtype)
    temp = 1.0 / jnp.sum(adj_hat, axis=1)
    temp = jnp.where(jnp.isnan(temp), 0.0, temp)
    adj_norm = jnp.diag(temp) @ adj_hat
    support = x @ weight
    return adj_norm @ support + bias


def _make_problem(key, n, f_in, f_out):
    k_x, k_adj, k_w, k_b = jax.random.split(key, 4)
    x = jax.random.normal(k_x, (n, f_in), dtype=jnp.float32)
    a = (jax.random.uniform(k_adj, (n, n)) > 0.5).astype(jnp.float32)
    adj = jnp.triu(a, 1)
    adj = adj + adj.T                       # symmetric, no self loops
    stdv = 1.0 / math.sqrt(f_out)           # mirrors reset_parameters()
    weight = jax.random.uniform(k_w, (f_in, f_out), minval=-stdv, maxval=stdv,
                                dtype=jnp.float32)
    bias = jax.random.uniform(k_b, (f_out,), minval=-stdv, maxval=stdv,
                              dtype=jnp.float32)
    return x, adj, weight, bias


if __name__ == "__main__":
    key = jax.random.PRNGKey(0)
    k1, k2 = jax.random.split(key)

    # Small problem (single-tile fast path): N=8 nodes, Fin=32, Fout=16.
    x, adj, w, b = _make_problem(k1, 8, 32, 16)
    out = jax.block_until_ready(graph_convolution(x, adj, w, b))
    ref = reference_gcn(x, adj, w, b)
    assert out.shape == (8, 16)
    assert jnp.allclose(out, ref, atol=1e-5, rtol=1e-5), "f32 mismatch (small)"

    # bf16 MXU path (precision-accepted): looser tolerance.
    out_bf16 = jax.block_until_ready(graph_convolution(x, adj, w, b,
                                                       use_bf16=True))
    assert jnp.allclose(out_bf16, ref, atol=3e-2, rtol=3e-2), "bf16 mismatch"

    # Larger, non-aligned problem to exercise the tiled grid and padding
    # (N=700 -> padded 1024, grid (2, 2)).
    x2, adj2, w2, b2 = _make_problem(k2, 700, 48, 20)
    out2 = jax.block_until_ready(graph_convolution(x2, adj2, w2, b2))
    ref2 = reference_gcn(x2, adj2, w2, b2)
    assert out2.shape == (700, 20)
    assert jnp.allclose(out2, ref2, atol=1e-4, rtol=1e-4), "f32 mismatch (tiled)"

    print("KERNEL_OK")
</pallas_src>

<mosaic_0001>
module attributes {stable_mosaic.version = 11 : i64} {
  func.func @_support_kernel(%arg0: i32, %arg1: memref<128x32xf32, #tpu.memory_space<vmem>>, %arg2: memref<32x128xf32, #tpu.memory_space<vmem>>, %arg3: memref<128x128xf32, #tpu.memory_space<vmem>>) attributes {dimension_semantics = [#tpu.dimension_semantics<parallel>], iteration_bounds = array<i64: 1>, scalar_prefetch = 0 : i64, scratch_operands = 0 : i64, tpu.core_type = #tpu.core_type<tc>, window_params = [{transform_indices = @transform_0, window_bounds = array<i64: 128, 32>}, {pipeline_mode = #tpu.pipeline_mode<synchronous>, transform_indices = @transform_1, window_bounds = array<i64: 32, 128>}, {transform_indices = @transform_2, window_bounds = array<i64: 128, 128>}]} {
    %c0 = arith.constant 0 : index
    %c0_0 = arith.constant 0 : index
    %0 = vector.load %arg1[%c0, %c0_0] : memref<128x32xf32, #tpu.memory_space<vmem>>, vector<128x32xf32>
    %c0_1 = arith.constant 0 : index
    %c0_2 = arith.constant 0 : index
    %1 = vector.load %arg2[%c0_1, %c0_2] : memref<32x128xf32, #tpu.memory_space<vmem>>, vector<32x128xf32>
    %cst = arith.constant dense<0.000000e+00> : vector<128x128xf32>
    %2 = tpu.matmul %0, %1, %cst {dimension_numbers = #tpu.dot_dimension_numbers<[1], [0], [0], [1], [0, 0, 1, 1], [], []>} : vector<128x32xf32>, vector<32x128xf32>, vector<128x128xf32> -> vector<128x128xf32>
    %c0_3 = arith.constant 0 : index
    %c0_4 = arith.constant 0 : index
    %3 = vector.load %arg3[%c0_3, %c0_4] : memref<128x128xf32, #tpu.memory_space<vmem>>, vector<128x128xf32>
    tpu.vector_store %arg3[%c0_3, %c0_4], %2 {strides = array<i32>} : memref<128x128xf32, #tpu.memory_space<vmem>>, vector<128x128xf32>,
    return
  }
  func.func @transform_0(%arg0: i32) -> (i32, i32) {
    %c0_i32 = arith.constant 0 : i32
    %c0_i32_0 = arith.constant 0 : i32
    return %arg0, %c0_i32 : i32, i32
  }
  func.func @transform_1(%arg0: i32) -> (i32, i32) {
    %c0_i32 = arith.constant 0 : i32
    %c0_i32_0 = arith.constant 0 : i32
    %c0_i32_1 = arith.constant 0 : i32
    return %c0_i32, %c0_i32_0 : i32, i32
  }
  func.func @transform_2(%arg0: i32) -> (i32, i32) {
    %c0_i32 = arith.constant 0 : i32
    %c0_i32_0 = arith.constant 0 : i32
    return %arg0, %c0_i32 : i32, i32
  }
}

</mosaic_0001>

<bundles_post_ra>
// kernel: tpu_custom_call.1
= control target key start
LH: loop header
LB: loop body
LE: loop exit
PB: predicated region body
PF: predicated region fallthrough
CT: control target
= control target key end

     0   :  { %vm32_vm0 = vcmask 261120   ;;  %s334_s0 = inlined_call_operand.vmem [shape: f32[128,32], index: 0, kind: input, shape index: {}]   ;;  %s335_s1 = inlined_call_operand.vmem [shape: f32[32,128], index: 1, kind: input, shape index: {}]   ;;  %s336_s2 = inlined_call_operand.hbm [shape: f32[128,128], index: 2, kind: output, shape index: {}]  }
   0x1   :  { %v31_v0 = vld [vmem:[%s335_s1 + $0x18] sm:$0xff]  ;;  %v30_v1 = vld [vmem:[%s335_s1 + $0x10] sm:$0xff]  ;;  %v29_v2 = vld [vmem:[%s335_s1 + $0x8] sm:$0xff] }
   0x2   :  { %197 = vmatpush.msra.mxu2 %v31_v0  ;;  %198 = vmatpush.msra.mxu3 %v31_v0  ;;  %v28_v3 = vld [vmem:[%s335_s1] sm:$0xff] }
   0x3   :  { %93 = vmatpush.msra.mxu0 %v31_v0  ;;  %196 = vmatpush.msra.mxu1 %v31_v0  ;;  %v20_v4 = vld [vmem:[%s334_s0 + $0x40] sm:$0xff] }
   0x4   :  { %200 = vmatpush.msra.mxu2 %v30_v1  ;;  %201 = vmatpush.msra.mxu3 %v30_v1  ;;  %v24_v5 = vld [vmem:[%s334_s0 + $0x60] sm:$0xff] }
   0x5   :  { %94 = vmatpush.msra.mxu0 %v30_v1  ;;  %199 = vmatpush.msra.mxu1 %v30_v1 }
   0x6   :  { %203 = vmatpush.msra.mxu2 %v29_v2  ;;  %204 = vmatpush.msra.mxu3 %v29_v2 }
   0x7   :  { %95 = vmatpush.msra.mxu0 %v29_v2  ;;  %202 = vmatpush.msra.mxu1 %v29_v2 }
   0x8   :  { %7 = vsyncpa [#allocation3], 0  ;;  %206 = vmatpush.msra.mxu2 %v28_v3  ;;  %207 = vmatpush.msra.mxu3 %v28_v3  ;;  %v12_v6 = vld [vmem:[%s334_s0] sm:$0xff]  ;;  %v21_v8 = vld [vmem:[%s334_s0 + $0x48] sm:$0xff]  ;;  %s168_s22 = sshll.u32 %s336_s2, 4  ;;  %s238_s23 = smov 128   ;;  %s169_s22 = int_to_ptr.hbm [resolvable:$true] %s168_s22 }
   0x9   :  { %v16_v7 = vld [vmem:[%s334_s0 + $0x20] sm:$0xff]  ;;  %188 = vmatmul.msk.f32.vlgmr.msra.gmra.mxu2 %vm32_vm0, %v20_v4  ;;  %192 = vmatmul.msk.f32.vlgmr.msra.gmra.mxu3 %vm32_vm0, %v24_v5  ;;  %v25_v9 = vld [vmem:[%s334_s0 + $0x68] sm:$0xff]  ;;  %v22_v12 = vld [vmem:[%s334_s0 + $0x50] sm:$0xff]  ;;  %s239_s24 = smov 8  }
   0xa   :  { %96 = vmatpush.msra.mxu0 %v28_v3  ;;  %205 = vmatpush.msra.mxu1 %v28_v3  ;;  %v13_v10 = vld [vmem:[%s334_s0 + $0x8] sm:$0xff]  ;;  %v26_v13 = vld [vmem:[%s334_s0 + $0x70] sm:$0xff]  ;;  %v23_v16 = vld [vmem:[%s334_s0 + $0x58] sm:$0xff] }
   0xb   :  { %180 = vmatmul.msk.f32.vlgmr.msra.gmra.mxu0 %vm32_vm0, %v12_v6  ;;  %184 = vmatmul.msk.f32.vlgmr.msra.gmra.mxu1 %vm32_vm0, %v16_v7  ;;  %v17_v11 = vld [vmem:[%s334_s0 + $0x28] sm:$0xff]  ;;  %v14_v14 = vld [vmem:[%s334_s0 + $0x10] sm:$0xff]  ;;  %v27_v17 = vld [vmem:[%s334_s0 + $0x78] sm:$0xff] }
   0xc   :  { %v18_v15 = vld [vmem:[%s334_s0 + $0x30] sm:$0xff]  ;;  %v15_v18 = vld [vmem:[%s334_s0 + $0x18] sm:$0xff] }
   0xd   :  { %v19_v19 = vld [vmem:[%s334_s0 + $0x38] sm:$0xff]  ;;  %s237_s0 = smov [#allocation2]  }
   0xe   :  { %s166_s20 = sshll.u32 %s237_s0, 4  ;;  %s167_s20 = int_to_ptr.vmem [resolvable:$true] %s166_s20 }
  0x11   :  { %189 = vmatmul.msk.f32.gmra.mxu2 %vm32_vm0, %v21_v8  ;;  %193 = vmatmul.msk.f32.gmra.mxu3 %vm32_vm0, %v25_v9 }
  0x13   :  { %181 = vmatmul.msk.f32.gmra.mxu0 %vm32_vm0, %v13_v10  ;;  %185 = vmatmul.msk.f32.gmra.mxu1 %vm32_vm0, %v17_v11 }
  0x19   :  { %190 = vmatmul.msk.f32.gmra.mxu2 %vm32_vm0, %v22_v12  ;;  %194 = vmatmul.msk.f32.gmra.mxu3 %vm32_vm0, %v26_v13 }
  0x1b   :  { %182 = vmatmul.msk.f32.gmra.mxu0 %vm32_vm0, %v14_v14  ;;  %186 = vmatmul.msk.f32.gmra.mxu1 %vm32_vm0, %v18_v15 }
  0x21   :  { %191 = vmatmul.msk.f32.gmra.mxu2 %vm32_vm0, %v23_v16  ;;  %195 = vmatmul.msk.f32.gmra.mxu3 %vm32_vm0, %v27_v17 }
  0x23   :  { %183 = vmatmul.msk.f32.gmra.mxu0 %vm32_vm0, %v15_v18  ;;  %187 = vmatmul.msk.f32.gmra.mxu1 %vm32_vm0, %v19_v19 }
  0x88   :  { %v98_v20 = vpop.f32.mrf.mxu0  ;;  %v110_v21 = vpop.f32.mrf.mxu1 }
  0x89   :  { %146 = vst [vmem:[#allocation2] sm:$0xff] %v98_v20 }
  0x8a   :  { %150 = vst [vmem:[#allocation2 + $0x20] sm:$0xff] %v110_v21 }
  0x8c   :  { %v122_v22 = vpop.f32.mrf.mxu2  ;;  %v134_v23 = vpop.f32.mrf.mxu3 }
  0x8d   :  { %154 = vst [vmem:[#allocation2 + $0x40] sm:$0xff] %v122_v22 }
  0x8e   :  { %158 = vst [vmem:[#allocation2 + $0x60] sm:$0xff] %v134_v23 }
  0x90   :  { %v101_v24 = vpop.f32.mrf.mxu0  ;;  %v113_v25 = vpop.f32.mrf.mxu1 }
  0x91   :  { %147 = vst [vmem:[#allocation2 + $0x8] sm:$0xff] %v101_v24 }
  0x92   :  { %151 = vst [vmem:[#allocation2 + $0x28] sm:$0xff] %v113_v25 }
  0x94   :  { %v125_v26 = vpop.f32.mrf.mxu2  ;;  %v137_v27 = vpop.f32.mrf.mxu3 }
  0x95   :  { %155 = vst [vmem:[#allocation2 + $0x48] sm:$0xff] %v125_v26 }
  0x96   :  { %159 = vst [vmem:[#allocation2 + $0x68] sm:$0xff] %v137_v27 }
  0x98   :  { %v104_v28 = vpop.f32.mrf.mxu0  ;;  %v116_v29 = vpop.f32.mrf.mxu1 }
  0x99   :  { %148 = vst [vmem:[#allocation2 + $0x10] sm:$0xff] %v104_v28 }
  0x9a   :  { %152 = vst [vmem:[#allocation2 + $0x30] sm:$0xff] %v116_v29 }
  0x9c   :  { %v128_v30 = vpop.f32.mrf.mxu2  ;;  %v140_v31 = vpop.f32.mrf.mxu3 }
  0x9d   :  { %156 = vst [vmem:[#allocation2 + $0x50] sm:$0xff] %v128_v30 }
  0x9e   :  { %160 = vst [vmem:[#allocation2 + $0x70] sm:$0xff] %v140_v31 }
  0xa0   :  { %v107_v32 = vpop.f32.mrf.mxu0  ;;  %v119_v33 = vpop.f32.mrf.mxu1 }
  0xa1   :  { %149 = vst [vmem:[#allocation2 + $0x18] sm:$0xff] %v107_v32 }
  0xa2   :  { %153 = vst [vmem:[#allocation2 + $0x38] sm:$0xff] %v119_v33 }
  0xa4   :  { %v131_v34 = vpop.f32.mrf.mxu2  ;;  %v143_v35 = vpop.f32.mrf.mxu3 }
  0xa5   :  { %157 = vst [vmem:[#allocation2 + $0x58] sm:$0xff] %v131_v34 }
  0xa6   :  { %161 = vst [vmem:[#allocation2 + $0x78] sm:$0xff] %v143_v35 }
  0xa7   :  { %174 = dma.vmem_to_hbm [thread:$0]  %s167_s20, 2048, %s169_s22, [#allocation3], %s238_s23, %s238_s23, %s239_s24  }
  0xa8   :  { %235 = dma.done.wait [#allocation3], 2048  }
  0xa9   :  { %236 = vsyncadd [#allocation3], 4294965248 }
  0xaa   :  { %179 = vsyncpa [#allocation3], 1 }

</bundles_post_ra>
